<compile_context>
chip_gen: v5e
topology: v5e:2x2
jax: 0.10.0
libtpu: 0.0.40
codegen_flags: <defaults>
</compile_context>

<pallas_src>
import functools

import jax
import jax.numpy as jnp
from jax import lax
from jax.experimental import pallas as pl
from jax.experimental.pallas import tpu as pltpu


def rnn_maxpool_kernel(x_ref, w_ref, out_ref, *, seq_len, batch, embed_dim, hidden_dim):
    D, H, B = embed_dim, hidden_dim, batch

    # Static, sublane-aligned slices of the single packed operand.
    wih = w_ref[0:D, :]                        # (D, H)  Wih^T
    whh = w_ref[D:D + H, :]                    # (H, H)  Whh^T
    bias = w_ref[D + H:D + H + 1, :]           # (1, H)  b_ih + b_hh
    len_off = D + H + 8                        # bias block padded to 8 sublanes
    len_bh = w_ref[len_off:len_off + B, :]     # (B, H)  sent_len broadcast over lanes

    # ---- Phase 1 (parallel): project every timestep in ONE MXU matmul ----
    #   P = X @ Wih^T + (b_ih + b_hh)      X: (T*B, D)  ->  P: (T*B, H)
    p_all = jnp.dot(x_ref[...], wih, preferred_element_type=jnp.float32) + bias

    h = jnp.zeros((B, H), jnp.float32)
    # -inf init: rows with len == T take the pure max of their hidden states (may be
    # negative); rows with len < T pick up an exact 0 from the masked steps, matching
    # torch's pad_packed_sequence zero-fill feeding the max.
    acc = jnp.full((B, H), -jnp.inf, jnp.float32)

    # ---- Phase 2 (serial recurrence): fully unrolled, static slices ----
    # Only one small matmul sits on the latency-critical h dependence per step.
    for t in range(seq_len):
        lo = t * B
        h = jnp.tanh(
            p_all[lo:lo + B, :]
            + jnp.dot(h, whh, preferred_element_type=jnp.float32)
        )
        # Validity select (t < sent_len[b]) replaces the old pre-broadcast mask multiply.
        acc = jnp.maximum(acc, jnp.where(len_bh > float(t), h, 0.0))

    out_ref[...] = acc.astype(out_ref.dtype)


def recurrent_encoder_max(sent, sent_len, w_ih, w_hh, b_ih, b_hh):
    """sent: (T, B, D) f32; sent_len: (B,) int; weights as in torch.nn.RNN layer 0."""
    T, B, D = sent.shape
    H = w_ih.shape[0]

    x_flat = jnp.asarray(sent, jnp.float32).reshape(T * B, D)          # (T*B, D)

    # Pack ALL small operands into one (D + H + 8 + pad(B), H) array -> 2 input DMAs total.
    wih_t = jnp.asarray(w_ih, jnp.float32).T                           # (D, H)
    whh_t = jnp.asarray(w_hh, jnp.float32).T                           # (H, H)
    bias = jnp.asarray(b_ih, jnp.float32) + jnp.asarray(b_hh, jnp.float32)
    bias_blk = jnp.broadcast_to(bias[None, :], (8, H))                 # sublane-padded
    b_pad = ((B + 7) // 8) * 8
    lens_f = jnp.asarray(sent_len, jnp.float32)
    len_blk = jnp.zeros((b_pad, H), jnp.float32).at[:B, :].set(
        jnp.broadcast_to(lens_f[:, None], (B, H))
    )
    packed = jnp.concatenate([wih_t, whh_t, bias_blk, len_blk], axis=0)  # (R, H)
    R = D + H + 8 + b_pad

    kernel = functools.partial(
        rnn_maxpool_kernel, seq_len=T, batch=B, embed_dim=D, hidden_dim=H
    )

    grid_spec = pltpu.PrefetchScalarGridSpec(
        num_scalar_prefetch=0,
        grid=(1,),                                   # single invocation; loop inside
        in_specs=[
            pl.BlockSpec((T * B, D), lambda i: (0, 0)),   # X (all timesteps)
            pl.BlockSpec((R, H), lambda i: (0, 0)),        # packed Wih^T|Whh^T|bias|lens
        ],
        out_specs=pl.BlockSpec((B, H), lambda i: (0, 0)),
    )

    return pl.pallas_call(
        kernel,
        out_shape=jax.ShapeDtypeStruct((B, H), jnp.float32),
        grid_spec=grid_spec,
        compiler_params=pltpu.CompilerParams(
            dimension_semantics=("arbitrary",),
        ),
    )(x_flat, packed)


def reference_jax(sent, sent_len, w_ih, w_hh, b_ih, b_hh):
    """Pure-JAX reference (scan) mirroring torch pack/RNN/pad/max semantics."""
    T, B, D = sent.shape
    bias = b_ih + b_hh

    def step(h, x_t):
        h_new = jnp.tanh(x_t @ w_ih.T + h @ w_hh.T + bias)
        return h_new, h_new

    h0 = jnp.zeros((B, w_ih.shape[0]), jnp.float32)
    _, outs = lax.scan(step, h0, sent)                       # (T, B, H)
    t_idx = jnp.arange(T)[:, None, None]
    mask = t_idx < sent_len[None, :, None]
    outs = jnp.where(mask, outs, 0.0)
    return jnp.max(outs, axis=0)


if __name__ == "__main__":
    # Small shapes consistent with the module: seq=8, batch=8, embed=32, hidden=32.
    T, B, D, H = 8, 8, 32, 32

    key = jax.random.PRNGKey(0)
    k_x, k_wih, k_whh, k_bih, k_bhh = jax.random.split(key, 5)

    sent = jax.random.normal(k_x, (T, B, D), dtype=jnp.float32)
    sent_len = jnp.array([8, 5, 3, 8, 2, 6, 8, 1], dtype=jnp.int32)

    # Deterministic init mimicking nn.RNN default: U(-1/sqrt(H), 1/sqrt(H))
    bound = 1.0 / (H ** 0.5)
    w_ih = jax.random.uniform(k_wih, (H, D), minval=-bound, maxval=bound, dtype=jnp.float32)
    w_hh = jax.random.uniform(k_whh, (H, H), minval=-bound, maxval=bound, dtype=jnp.float32)
    b_ih = jax.random.uniform(k_bih, (H,), minval=-bound, maxval=bound, dtype=jnp.float32)
    b_hh = jax.random.uniform(k_bhh, (H,), minval=-bound, maxval=bound, dtype=jnp.float32)

    emb = recurrent_encoder_max(sent, sent_len, w_ih, w_hh, b_ih, b_hh)
    emb = jax.block_until_ready(emb)

    ref = reference_jax(sent, sent_len, w_ih, w_hh, b_ih, b_hh)
    assert emb.shape == (B, H)
    assert jnp.allclose(emb, ref, atol=1e-5, rtol=1e-5), "mismatch vs JAX reference"

    print("KERNEL_OK")
</pallas_src>

<mosaic_0001>
module attributes {stable_mosaic.version = 11 : i64} {
  func.func @rnn_maxpool_kernel(%arg0: i32, %arg1: memref<64x32xf32, #tpu.memory_space<vmem>>, %arg2: memref<80x32xf32, #tpu.memory_space<vmem>>, %arg3: memref<8x32xf32, #tpu.memory_space<vmem>>) attributes {dimension_semantics = [#tpu.dimension_semantics<arbitrary>], iteration_bounds = array<i64: 1>, scalar_prefetch = 0 : i64, scratch_operands = 0 : i64, tpu.core_type = #tpu.core_type<tc>, window_params = [{pipeline_mode = #tpu.pipeline_mode<synchronous>, transform_indices = @transform_0, window_bounds = array<i64: 64, 32>}, {pipeline_mode = #tpu.pipeline_mode<synchronous>, transform_indices = @transform_1, window_bounds = array<i64: 80, 32>}, {pipeline_mode = #tpu.pipeline_mode<synchronous>, transform_indices = @transform_2, window_bounds = array<i64: 8, 32>}]} {
    %c0 = arith.constant 0 : index
    %c0_0 = arith.constant 0 : index
    %0 = vector.load %arg2[%c0, %c0_0] : memref<80x32xf32, #tpu.memory_space<vmem>>, vector<32x32xf32>
    %c32 = arith.constant 32 : index
    %c0_1 = arith.constant 0 : index
    %1 = vector.load %arg2[%c32, %c0_1] : memref<80x32xf32, #tpu.memory_space<vmem>>, vector<32x32xf32>
    %c64 = arith.constant 64 : index
    %c0_2 = arith.constant 0 : index
    %2 = vector.load %arg2[%c64, %c0_2] : memref<80x32xf32, #tpu.memory_space<vmem>>, vector<1x32xf32>
    %c72 = arith.constant 72 : index
    %c0_3 = arith.constant 0 : index
    %3 = vector.load %arg2[%c72, %c0_3] : memref<80x32xf32, #tpu.memory_space<vmem>>, vector<8x32xf32>
    %c0_4 = arith.constant 0 : index
    %c0_5 = arith.constant 0 : index
    %4 = vector.load %arg1[%c0_4, %c0_5] : memref<64x32xf32, #tpu.memory_space<vmem>>, vector<64x32xf32>
    %cst = arith.constant dense<0.000000e+00> : vector<64x32xf32>
    %5 = tpu.matmul %4, %0, %cst {dimension_numbers = #tpu.dot_dimension_numbers<[1], [0], [0], [1], [0, 0, 1, 1], [], []>} : vector<64x32xf32>, vector<32x32xf32>, vector<64x32xf32> -> vector<64x32xf32>
    %6 = vector.broadcast %2 : vector<1x32xf32> to vector<64x32xf32>
    %7 = arith.addf %5, %6 : vector<64x32xf32>
    %cst_6 = arith.constant 0.000000e+00 : f32
    %8 = vector.broadcast %cst_6 : f32 to vector<8x32xf32>
    %cst_7 = arith.constant 0xFF800000 : f32
    %9 = vector.broadcast %cst_7 : f32 to vector<8x32xf32>
    %10 = vector.extract_strided_slice %7 {offsets = [0, 0], sizes = [8, 32], strides = [1, 1]} : vector<64x32xf32> to vector<8x32xf32>
    %cst_8 = arith.constant dense<0.000000e+00> : vector<8x32xf32>
    %11 = tpu.matmul %8, %1, %cst_8 {dimension_numbers = #tpu.dot_dimension_numbers<[1], [0], [0], [1], [0, 0, 1, 1], [], []>} : vector<8x32xf32>, vector<32x32xf32>, vector<8x32xf32> -> vector<8x32xf32>
    %12 = arith.addf %10, %11 : vector<8x32xf32>
    %13 = math.tanh %12 : vector<8x32xf32>
    %cst_9 = arith.constant 0.000000e+00 : f32
    %14 = vector.broadcast %cst_9 : f32 to vector<8x32xf32>
    %15 = arith.cmpf ogt, %3, %14 : vector<8x32xf32>
    %cst_10 = arith.constant 0.000000e+00 : f32
    %16 = vector.broadcast %cst_10 : f32 to vector<8x32xf32>
    %17 = arith.select %15, %13, %16 : vector<8x32xi1>, vector<8x32xf32>
    %18 = arith.maximumf %9, %17 : vector<8x32xf32>
    %19 = vector.extract_strided_slice %7 {offsets = [8, 0], sizes = [8, 32], strides = [1, 1]} : vector<64x32xf32> to vector<8x32xf32>
    %cst_11 = arith.constant dense<0.000000e+00> : vector<8x32xf32>
    %20 = tpu.matmul %13, %1, %cst_11 {dimension_numbers = #tpu.dot_dimension_numbers<[1], [0], [0], [1], [0, 0, 1, 1], [], []>} : vector<8x32xf32>, vector<32x32xf32>, vector<8x32xf32> -> vector<8x32xf32>
    %21 = arith.addf %19, %20 : vector<8x32xf32>
    %22 = math.tanh %21 : vector<8x32xf32>
    %cst_12 = arith.constant 1.000000e+00 : f32
    %23 = vector.broadcast %cst_12 : f32 to vector<8x32xf32>
    %24 = arith.cmpf ogt, %3, %23 : vector<8x32xf32>
    %cst_13 = arith.constant 0.000000e+00 : f32
    %25 = vector.broadcast %cst_13 : f32 to vector<8x32xf32>
    %26 = arith.select %24, %22, %25 : vector<8x32xi1>, vector<8x32xf32>
    %27 = arith.maximumf %18, %26 : vector<8x32xf32>
    %28 = vector.extract_strided_slice %7 {offsets = [16, 0], sizes = [8, 32], strides = [1, 1]} : vector<64x32xf32> to vector<8x32xf32>
    %cst_14 = arith.constant dense<0.000000e+00> : vector<8x32xf32>
    %29 = tpu.matmul %22, %1, %cst_14 {dimension_numbers = #tpu.dot_dimension_numbers<[1], [0], [0], [1], [0, 0, 1, 1], [], []>} : vector<8x32xf32>, vector<32x32xf32>, vector<8x32xf32> -> vector<8x32xf32>
    %30 = arith.addf %28, %29 : vector<8x32xf32>
    %31 = math.tanh %30 : vector<8x32xf32>
    %cst_15 = arith.constant 2.000000e+00 : f32
    %32 = vector.broadcast %cst_15 : f32 to vector<8x32xf32>
    %33 = arith.cmpf ogt, %3, %32 : vector<8x32xf32>
    %cst_16 = arith.constant 0.000000e+00 : f32
    %34 = vector.broadcast %cst_16 : f32 to vector<8x32xf32>
    %35 = arith.select %33, %31, %34 : vector<8x32xi1>, vector<8x32xf32>
    %36 = arith.maximumf %27, %35 : vector<8x32xf32>
    %37 = vector.extract_strided_slice %7 {offsets = [24, 0], sizes = [8, 32], strides = [1, 1]} : vector<64x32xf32> to vector<8x32xf32>
    %cst_17 = arith.constant dense<0.000000e+00> : vector<8x32xf32>
    %38 = tpu.matmul %31, %1, %cst_17 {dimension_numbers = #tpu.dot_dimension_numbers<[1], [0], [0], [1], [0, 0, 1, 1], [], []>} : vector<8x32xf32>, vector<32x32xf32>, vector<8x32xf32> -> vector<8x32xf32>
    %39 = arith.addf %37, %38 : vector<8x32xf32>
    %40 = math.tanh %39 : vector<8x32xf32>
    %cst_18 = arith.constant 3.000000e+00 : f32
    %41 = vector.broadcast %cst_18 : f32 to vector<8x32xf32>
    %42 = arith.cmpf ogt, %3, %41 : vector<8x32xf32>
    %cst_19 = arith.constant 0.000000e+00 : f32
    %43 = vector.broadcast %cst_19 : f32 to vector<8x32xf32>
    %44 = arith.select %42, %40, %43 : vector<8x32xi1>, vector<8x32xf32>
    %45 = arith.maximumf %36, %44 : vector<8x32xf32>
    %46 = vector.extract_strided_slice %7 {offsets = [32, 0], sizes = [8, 32], strides = [1, 1]} : vector<64x32xf32> to vector<8x32xf32>
    %cst_20 = arith.constant dense<0.000000e+00> : vector<8x32xf32>
    %47 = tpu.matmul %40, %1, %cst_20 {dimension_numbers = #tpu.dot_dimension_numbers<[1], [0], [0], [1], [0, 0, 1, 1], [], []>} : vector<8x32xf32>, vector<32x32xf32>, vector<8x32xf32> -> vector<8x32xf32>
    %48 = arith.addf %46, %47 : vector<8x32xf32>
    %49 = math.tanh %48 : vector<8x32xf32>
    %cst_21 = arith.constant 4.000000e+00 : f32
    %50 = vector.broadcast %cst_21 : f32 to vector<8x32xf32>
    %51 = arith.cmpf ogt, %3, %50 : vector<8x32xf32>
    %cst_22 = arith.constant 0.000000e+00 : f32
    %52 = vector.broadcast %cst_22 : f32 to vector<8x32xf32>
    %53 = arith.select %51, %49, %52 : vector<8x32xi1>, vector<8x32xf32>
    %54 = arith.maximumf %45, %53 : vector<8x32xf32>
    %55 = vector.extract_strided_slice %7 {offsets = [40, 0], sizes = [8, 32], strides = [1, 1]} : vector<64x32xf32> to vector<8x32xf32>
    %cst_23 = arith.constant dense<0.000000e+00> : vector<8x32xf32>
    %56 = tpu.matmul %49, %1, %cst_23 {dimension_numbers = #tpu.dot_dimension_numbers<[1], [0], [0], [1], [0, 0, 1, 1], [], []>} : vector<8x32xf32>, vector<32x32xf32>, vector<8x32xf32> -> vector<8x32xf32>
    %57 = arith.addf %55, %56 : vector<8x32xf32>
    %58 = math.tanh %57 : vector<8x32xf32>
    %cst_24 = arith.constant 5.000000e+00 : f32
    %59 = vector.broadcast %cst_24 : f32 to vector<8x32xf32>
    %60 = arith.cmpf ogt, %3, %59 : vector<8x32xf32>
    %cst_25 = arith.constant 0.000000e+00 : f32
    %61 = vector.broadcast %cst_25 : f32 to vector<8x32xf32>
    %62 = arith.select %60, %58, %61 : vector<8x32xi1>, vector<8x32xf32>
    %63 = arith.maximumf %54, %62 : vector<8x32xf32>
    %64 = vector.extract_strided_slice %7 {offsets = [48, 0], sizes = [8, 32], strides = [1, 1]} : vector<64x32xf32> to vector<8x32xf32>
    %cst_26 = arith.constant dense<0.000000e+00> : vector<8x32xf32>
    %65 = tpu.matmul %58, %1, %cst_26 {dimension_numbers = #tpu.dot_dimension_numbers<[1], [0], [0], [1], [0, 0, 1, 1], [], []>} : vector<8x32xf32>, vector<32x32xf32>, vector<8x32xf32> -> vector<8x32xf32>
    %66 = arith.addf %64, %65 : vector<8x32xf32>
    %67 = math.tanh %66 : vector<8x32xf32>
    %cst_27 = arith.constant 6.000000e+00 : f32
    %68 = vector.broadcast %cst_27 : f32 to vector<8x32xf32>
    %69 = arith.cmpf ogt, %3, %68 : vector<8x32xf32>
    %cst_28 = arith.constant 0.000000e+00 : f32
    %70 = vector.broadcast %cst_28 : f32 to vector<8x32xf32>
    %71 = arith.select %69, %67, %70 : vector<8x32xi1>, vector<8x32xf32>
    %72 = arith.maximumf %63, %71 : vector<8x32xf32>
    %73 = vector.extract_strided_slice %7 {offsets = [56, 0], sizes = [8, 32], strides = [1, 1]} : vector<64x32xf32> to vector<8x32xf32>
    %cst_29 = arith.constant dense<0.000000e+00> : vector<8x32xf32>
    %74 = tpu.matmul %67, %1, %cst_29 {dimension_numbers = #tpu.dot_dimension_numbers<[1], [0], [0], [1], [0, 0, 1, 1], [], []>} : vector<8x32xf32>, vector<32x32xf32>, vector<8x32xf32> -> vector<8x32xf32>
    %75 = arith.addf %73, %74 : vector<8x32xf32>
    %76 = math.tanh %75 : vector<8x32xf32>
    %cst_30 = arith.constant 7.000000e+00 : f32
    %77 = vector.broadcast %cst_30 : f32 to vector<8x32xf32>
    %78 = arith.cmpf ogt, %3, %77 : vector<8x32xf32>
    %cst_31 = arith.constant 0.000000e+00 : f32
    %79 = vector.broadcast %cst_31 : f32 to vector<8x32xf32>
    %80 = arith.select %78, %76, %79 : vector<8x32xi1>, vector<8x32xf32>
    %81 = arith.maximumf %72, %80 : vector<8x32xf32>
    %c0_32 = arith.constant 0 : index
    %c0_33 = arith.constant 0 : index
    %82 = vector.load %arg3[%c0_32, %c0_33] : memref<8x32xf32, #tpu.memory_space<vmem>>, vector<8x32xf32>
    tpu.vector_store %arg3[%c0_32, %c0_33], %81 {strides = array<i32>} : memref<8x32xf32, #tpu.memory_space<vmem>>, vector<8x32xf32>,
    return
  }
  func.func @transform_0(%arg0: i32) -> (i32, i32) {
    %c0_i32 = arith.constant 0 : i32
    %c0_i32_0 = arith.constant 0 : i32
    %c0_i32_1 = arith.constant 0 : i32
    return %c0_i32, %c0_i32_0 : i32, i32
  }
  func.func @transform_1(%arg0: i32) -> (i32, i32) {
    %c0_i32 = arith.constant 0 : i32
    %c0_i32_0 = arith.constant 0 : i32
    %c0_i32_1 = arith.constant 0 : i32
    return %c0_i32, %c0_i32_0 : i32, i32
  }
  func.func @transform_2(%arg0: i32) -> (i32, i32) {
    %c0_i32 = arith.constant 0 : i32
    %c0_i32_0 = arith.constant 0 : i32
    %c0_i32_1 = arith.constant 0 : i32
    return %c0_i32, %c0_i32_0 : i32, i32
  }
}

</mosaic_0001>

<bundles_post_ra>
// kernel: tpu_custom_call.1
= control target key start
LH: loop header
LB: loop body
LE: loop exit
PB: predicated region body
PF: predicated region fallthrough
CT: control target
= control target key end

     0   :  { %s519_s0 = inlined_call_operand.vmem [shape: f32[64,32], index: 0, kind: input, shape index: {}]   ;;  %s520_s1 = inlined_call_operand.vmem [shape: f32[80,32], index: 1, kind: input, shape index: {}]   ;;  %s521_s2 = inlined_call_operand.hbm [shape: f32[8,32], index: 2, kind: output, shape index: {}]  }
   0x1   :  { %v15_v0 = vld [vmem:[%s520_s1 + $0x18] sm:$0xff]  ;;  %v14_v1 = vld [vmem:[%s520_s1 + $0x10] sm:$0xff]  ;;  %v13_v2 = vld [vmem:[%s520_s1 + $0x8] sm:$0xff] }
   0x2   :  { %352 = vmatpush.msra.mxu1 %v15_v0  ;;  %68 = vmatpush.msra.mxu0 %v15_v0  ;;  %v12_v3 = vld [vmem:[%s520_s1] sm:$0xff] }
   0x3   :  { %353 = vmatpush.msra.mxu2 %v15_v0  ;;  %354 = vmatpush.msra.mxu3 %v15_v0 }
   0x4   :  { %355 = vmatpush.msra.mxu1 %v14_v1  ;;  %69 = vmatpush.msra.mxu0 %v14_v1 }
   0x5   :  { %356 = vmatpush.msra.mxu2 %v14_v1  ;;  %357 = vmatpush.msra.mxu3 %v14_v1 }
   0x6   :  { %7 = vsyncpa [#allocation3], 0  ;;  %358 = vmatpush.msra.mxu1 %v13_v2  ;;  %v26_v4 = vld [vmem:[%s519_s0 + $0x20] sm:$0xff]  ;;  %vm31_vm0 = vcmask 261120   ;;  %70 = vmatpush.msra.mxu0 %v13_v2  ;;  %v19_v6 = vld [vmem:[%s520_s1 + $0x38] sm:$0xff]  ;;  %v409_v10 = vmov 0.0  }
   0x7   :  { %v22_v5 = vld [vmem:[%s519_s0] sm:$0xff]  ;;  %359 = vmatpush.msra.mxu2 %v13_v2  ;;  %360 = vmatpush.msra.mxu3 %v13_v2  ;;  %v18_v7 = vld [vmem:[%s520_s1 + $0x30] sm:$0xff]  ;;  %v17_v8 = vld [vmem:[%s520_s1 + $0x28] sm:$0xff]  ;;  %s328_s19 = sshll.u32 %s521_s2, 4  ;;  %s329_s19 = int_to_ptr.hbm [resolvable:$true] %s328_s19 }
   0x8   :  { %361 = vmatpush.msra.mxu1 %v12_v3  ;;  %71 = vmatpush.msra.mxu0 %v12_v3  ;;  %v16_v9 = vld [vmem:[%s520_s1 + $0x20] sm:$0xff]  ;;  %v27_v11 = vld [vmem:[%s519_s0 + $0x28] sm:$0xff]  ;;  %v28_v20 = vld [vmem:[%s519_s0 + $0x30] sm:$0xff] }
   0x9   :  { %341 = vmatmul.msk.f32.vlgmr.msra.gmra.mxu1 %vm31_vm0, %v26_v4  ;;  %337 = vmatmul.msk.f32.vlgmr.msra.gmra.mxu0 %vm31_vm0, %v22_v5  ;;  %v23_v12 = vld [vmem:[%s519_s0 + $0x8] sm:$0xff]  ;;  %v469_v15 = vld [vmem:[%s520_s1 + $0x40] ss:$0 sm:$0xff]  ;;  %v29_v21 = vld [vmem:[%s519_s0 + $0x38] sm:$0xff] }
   0xa   :  { %112 = vmatpush.msrb.mxu1 %v19_v6  ;;  %362 = vmatpush.msra.mxu2 %v12_v3  ;;  %v24_v22 = vld [vmem:[%s519_s0 + $0x10] sm:$0xff]  ;;  %v489_v28 = vld [vmem:[%s520_s1 + $0x48] sm:$0xff]  ;;  %v25_v33 = vld [vmem:[%s519_s0 + $0x18] sm:$0xff]  ;;  %s410_s0 = smov [#allocation2]  }
   0xb   :  { %363 = vmatpush.msra.mxu3 %v12_v3  ;;  %342 = vmatmul.msk.f32.vlgmr.msra.gmra.mxu2 %vm31_vm0, %v27_v11  ;;  %vm122_vm1 = vcmp.gt.f32.partialorder %v489_v28, 0.0  ;;  %vm149_vm2 = vcmp.gt.f32.partialorder %v489_v28, 1.0  ;;  %vm177_vm3 = vcmp.gt.f32.partialorder %v489_v28, 2.0  ;;  %vm205_vm4 = vcmp.gt.f32.partialorder %v489_v28, 3.0  ;;  %s326_s1 = sshll.u32 %s410_s0, 4  ;;  %s327_s1 = int_to_ptr.vmem [resolvable:$true] %s326_s1 }
   0xc   :  { %139 = vmatpush.msrb.mxu2 %v19_v6  ;;  %113 = vmatpush.msrb.mxu1 %v18_v7  ;;  %vm233_vm5 = vcmp.gt.f32.partialorder %v489_v28, 4.0  ;;  %vm261_vm6 = vcmp.gt.f32.partialorder %v489_v28, 5.0  ;;  %vm289_vm7 = vcmp.gt.f32.partialorder %v489_v28, 6.0  ;;  %vm317_vm8 = vcmp.gt.f32.partialorder %v489_v28, 7.0 }
   0xd   :  { %167 = vmatpush.msrb.mxu3 %v19_v6 }
   0xe   :  { %140 = vmatpush.msrb.mxu2 %v18_v7  ;;  %114 = vmatpush.msrb.mxu1 %v17_v8 }
   0xf   :  { %168 = vmatpush.msrb.mxu3 %v18_v7 }
  0x10   :  { %141 = vmatpush.msrb.mxu2 %v17_v8  ;;  %115 = vmatpush.msrb.mxu1 %v16_v9 }
  0x11   :  { %169 = vmatpush.msrb.mxu3 %v17_v8  ;;  %116 = vmatmul.f32.vlgmr.msrb.gmra.mxu1 %v409_v10 }
  0x12   :  { %142 = vmatpush.msrb.mxu2 %v16_v9  ;;  %195 = vmatpush.msra.mxu1 %v19_v6 }
  0x13   :  { %170 = vmatpush.msrb.mxu3 %v16_v9  ;;  %338 = vmatmul.msk.f32.gmra.mxu0 %vm31_vm0, %v23_v12 }
  0x14   :  { %196 = vmatpush.msra.mxu1 %v18_v7  ;;  %223 = vmatpush.msra.mxu2 %v19_v6 }
  0x15   :  { %343 = vmatmul.msk.f32.vlgmr.msra.gmra.mxu3 %vm31_vm0, %v28_v20 }
  0x16   :  { %197 = vmatpush.msra.mxu1 %v17_v8  ;;  %224 = vmatpush.msra.mxu2 %v18_v7 }
  0x17   :  { %251 = vmatpush.msra.mxu3 %v19_v6 }
  0x18   :  { %198 = vmatpush.msra.mxu1 %v16_v9  ;;  %225 = vmatpush.msra.mxu2 %v17_v8 }
  0x19   :  { %252 = vmatpush.msra.mxu3 %v18_v7 }
  0x1a   :  { %279 = vmatpush.msrb.mxu1 %v19_v6  ;;  %226 = vmatpush.msra.mxu2 %v16_v9 }
  0x1b   :  { %253 = vmatpush.msra.mxu3 %v17_v8  ;;  %339 = vmatmul.msk.f32.gmra.mxu0 %vm31_vm0, %v24_v22 }
  0x1c   :  { %280 = vmatpush.msrb.mxu1 %v18_v7 }
  0x1d   :  { %254 = vmatpush.msra.mxu3 %v16_v9 }
  0x1e   :  { %281 = vmatpush.msrb.mxu1 %v17_v8  ;;  %344 = vmatmul.msk.f32.gmra.mxu3 %vm31_vm0, %v29_v21 }
  0x20   :  { %282 = vmatpush.msrb.mxu1 %v16_v9 }
  0x23   :  { %340 = vmatmul.msk.f32.gmra.mxu0 %vm31_vm0, %v25_v33 }
  0x86   :  { %v85_v13 = vpop.f32.mrf.mxu1  ;;  %v73_v14 = vpop.f32.mrf.mxu0 }
  0x87   :  { %v74_v16 = vadd.f32 %v469_v15, %v73_v14  ;;  %v86_v50 = vadd.f32 %v469_v15, %v85_v13 }
  0x8e   :  { %v117_v17 = vpop.f32.mrf.mxu1  ;;  %v88_v23 = vpop.f32.mrf.mxu2 }
  0x8f   :  { %v120_v18 = vadd.f32 %v117_v17, %v74_v16  ;;  %v89_v56 = vadd.f32 %v469_v15, %v88_v23 }
  0x90   :  { %v76_v24 = vpop.f32.mrf.mxu0 }
  0x91   :  { %367 = vtanh.f32 %v120_v18  ;;  %v77_v25 = vadd.f32 %v469_v15, %v76_v24 }
  0x97   :  { %v368_v19 = vpop.eup %367 }
  0x98   :  { %345 = vmatmul.msk.f32.vlgmr.msrb.gmra.mxu2 %vm31_vm0, %v368_v19  ;;  %v123_v30 = vsel %vm122_vm1, %v368_v19, 0.0  ;;  %v91_v34 = vpop.f32.mrf.mxu3  ;;  %v79_v36 = vpop.f32.mrf.mxu0 }
  0x99   :  { %307 = vmatpush.msrb.mxu2 %v19_v6  ;;  %v80_v37 = vadd.f32 %v469_v15, %v79_v36  ;;  %v92_v62 = vadd.f32 %v469_v15, %v91_v34 }
  0x9b   :  { %308 = vmatpush.msrb.mxu2 %v18_v7 }
  0x9d   :  { %309 = vmatpush.msrb.mxu2 %v17_v8 }
  0x9f   :  { %310 = vmatpush.msrb.mxu2 %v16_v9 }
  0xa0   :  { %v82_v43 = vpop.f32.mrf.mxu0 }
  0xa1   :  { %v94_v35 = vpop.f32.mrf.mxu3  ;;  %v83_v44 = vadd.f32 %v469_v15, %v82_v43 }
  0xa2   :  { %v95_v4 = vadd.f32 %v469_v15, %v94_v35 }
 0x11b   :  { %v144_v26 = vpop.f32.mrf.mxu2 }
 0x11c   :  { %v147_v27 = vadd.f32 %v144_v26, %v77_v25 }
 0x11e   :  { %369 = vtanh.f32 %v147_v27 }
 0x124   :  { %v370_v29 = vpop.eup %369 }
 0x125   :  { %v150_v31 = vsel %vm149_vm2, %v370_v29, 0.0  ;;  %346 = vmatmul.msk.f32.vlgmr.msrb.gmra.mxu3 %vm31_vm0, %v370_v29 }
 0x126   :  { %v151_v32 = vmax.f32 %v123_v30, %v150_v31 }
 0x1a8   :  { %v172_v38 = vpop.f32.mrf.mxu3 }
 0x1a9   :  { %v175_v39 = vadd.f32 %v172_v38, %v80_v37 }
 0x1ab   :  { %371 = vtanh.f32 %v175_v39 }
 0x1b1   :  { %v372_v40 = vpop.eup %371 }
 0x1b2   :  { %v178_v41 = vsel %vm177_vm3, %v372_v40, 0.0  ;;  %347 = vmatmul.msk.f32.vlgmr.msra.gmra.mxu1 %vm31_vm0, %v372_v40 }
 0x1b3   :  { %v179_v42 = vmax.f32 %v151_v32, %v178_v41 }
 0x22f   :  { %v200_v45 = vpop.f32.mrf.mxu1 }
 0x230   :  { %v203_v46 = vadd.f32 %v200_v45, %v83_v44 }
 0x232   :  { %373 = vtanh.f32 %v203_v46 }
 0x238   :  { %v374_v47 = vpop.eup %373 }
 0x239   :  { %v206_v48 = vsel %vm205_vm4, %v374_v47, 0.0  ;;  %348 = vmatmul.msk.f32.vlgmr.msra.gmra.mxu2 %vm31_vm0, %v374_v47 }
 0x23a   :  { %v207_v49 = vmax.f32 %v179_v42, %v206_v48 }
 0x2bc   :  { %v228_v51 = vpop.f32.mrf.mxu2 }
 0x2bd   :  { %v231_v52 = vadd.f32 %v228_v51, %v86_v50 }
 0x2bf   :  { %375 = vtanh.f32 %v231_v52 }
 0x2c5   :  { %v376_v53 = vpop.eup %375 }
 0x2c6   :  { %v234_v54 = vsel %vm233_vm5, %v376_v53, 0.0  ;;  %349 = vmatmul.msk.f32.vlgmr.msra.gmra.mxu3 %vm31_vm0, %v376_v53 }
 0x2c7   :  { %v235_v55 = vmax.f32 %v207_v49, %v234_v54 }
 0x349   :  { %v256_v57 = vpop.f32.mrf.mxu3 }
 0x34a   :  { %v259_v58 = vadd.f32 %v256_v57, %v89_v56 }
 0x34c   :  { %377 = vtanh.f32 %v259_v58 }
 0x352   :  { %v378_v59 = vpop.eup %377 }
 0x353   :  { %v262_v60 = vsel %vm261_vm6, %v378_v59, 0.0  ;;  %350 = vmatmul.msk.f32.vlgmr.msrb.gmra.mxu1 %vm31_vm0, %v378_v59 }
 0x354   :  { %v263_v61 = vmax.f32 %v235_v55, %v262_v60 }
 0x3d0   :  { %v284_v63 = vpop.f32.mrf.mxu1 }
 0x3d1   :  { %v287_v0 = vadd.f32 %v284_v63, %v92_v62 }
 0x3d3   :  { %379 = vtanh.f32 %v287_v0 }
 0x3d9   :  { %v380_v1 = vpop.eup %379 }
 0x3da   :  { %v290_v2 = vsel %vm289_vm7, %v380_v1, 0.0  ;;  %351 = vmatmul.msk.f32.vlgmr.msrb.gmra.mxu2 %vm31_vm0, %v380_v1 }
 0x3db   :  { %v291_v3 = vmax.f32 %v263_v61, %v290_v2 }
 0x45d   :  { %v312_v5 = vpop.f32.mrf.mxu2 }
 0x45e   :  { %v315_v6 = vadd.f32 %v312_v5, %v95_v4 }
 0x460   :  { %381 = vtanh.f32 %v315_v6 }
 0x466   :  { %v382_v7 = vpop.eup %381 }
 0x467   :  { %v318_v8 = vsel %vm317_vm8, %v382_v7, 0.0 }
 0x468   :  { %v319_v9 = vmax.f32 %v291_v3, %v318_v8 }
 0x46a   :  { %320 = vst.msk [vmem:[#allocation2] sm:$0xff] %vm31_vm0, %v319_v9 }
 0x46b   :  { %331 = dma.vmem_to_hbm [thread:$0]  %s327_s1, 128, %s329_s19, [#allocation3]  }
 0x46c   :  { %407 = dma.done.wait [#allocation3], 128  }
 0x46d   :  { %408 = vsyncadd [#allocation3], 4294967168 }
 0x46e   :  { %336 = vsyncpa [#allocation3], 1 }

</bundles_post_ra>
